<compile_context>
chip_gen: v7x
topology: tpu7x:2x2x1
jax: 0.10.0
libtpu: 0.0.40
codegen_flags: <defaults>
</compile_context>

<pallas_src>
import functools

import numpy as np

import jax
import jax.numpy as jnp
from jax import lax
from jax.experimental import pallas as pl
from jax.experimental.pallas import tpu as pltpu


def _shift_reflect(x, s, *, axis, size, idx):
    """y[..., r, ...] = x[..., reflect(r + s), ...] along `axis`.

    `reflect` is ReflectionPad2d-style (no edge repetition).  The bulk shift is
    a circular pltpu.roll (XLU); only the |s| wrapped positions are patched
    with jnp.where selects against the hoisted iota mask `idx`.
    """
    if s == 0:
        return x
    axis = axis % x.ndim
    y = pltpu.roll(x, shift=(-s) % size, axis=axis)
    if s > 0:
        # wrapped positions r0 = size-s .. size-1 need x[2*(size-1) - (r0+s)]
        wrong = [(size - s + q, size - 2 - q) for q in range(s)]
    else:
        t = -s
        # wrapped positions r0 = 0 .. t-1 need x[t - r0]
        wrong = [(q, t - q) for q in range(t)]
    for r0, src in wrong:
        src_slice = lax.slice_in_dim(x, src, src + 1, axis=axis)
        y = jnp.where(idx == r0, src_slice, y)
    return y


def _conv_deriv_kernel(x_ref, o_ref, *, taps_by_col, H, W):
    """One grid step = one block of batch images (channel dim squeezed out).

    x_ref / o_ref : VMEM (B, H, W)
    taps_by_col   : static ((sw, ((sh, w), ...)), ...); sw/sh are column/row
                    offsets relative to the center, w already includes 1/resol,
                    zero-weight taps removed at trace time.
    """
    xv = x_ref[...].astype(jnp.float32)          # f32 accumulation

    need_col = any(sw != 0 for sw, _ in taps_by_col)
    need_row = any(sh != 0 for _, rows in taps_by_col for sh, _ in rows)
    # Hoisted 2-D iota masks; broadcast over batch inside jnp.where.
    col_idx = lax.broadcasted_iota(jnp.int32, (H, W), 1) if need_col else None
    row_idx = lax.broadcasted_iota(jnp.int32, (H, W), 0) if need_row else None

    acc = None
    for sw, rows in taps_by_col:
        # One lane-shifted slab per filter column, reused by all row offsets.
        slab = _shift_reflect(xv, sw, axis=2, size=W, idx=col_idx)
        for sh, w in rows:
            tap = _shift_reflect(slab, sh, axis=1, size=H, idx=row_idx)
            term = w * tap
            acc = term if acc is None else acc + term   # first tap inits acc
    if acc is None:                                     # all-zero filter
        acc = jnp.zeros(xv.shape, jnp.float32)
    o_ref[...] = acc.astype(o_ref.dtype)


def _pick_batch_block(n_batch, bytes_per_image, target_bytes):
    """Batch-block size from the tile target alone (no divisor-of-N rule);
    prefer an even grid length so a v7x megacore stays balanced."""
    cap = max(1, int(target_bytes) // max(int(bytes_per_image), 1))
    b0 = min(cap, n_batch)
    steps0 = -(-n_batch // b0)
    if steps0 <= 1:
        # Everything fits one tile; split in two only if the work is sizeable.
        if n_batch >= 2 and n_batch * bytes_per_image >= (1 << 21):
            return -(-n_batch // 2)
        return b0
    if steps0 % 2 == 0:
        return b0
    # Look near the target block size for an even step count (tiles stay
    # within [0.5x, 1.5x] of the target).
    lo = max(1, b0 // 2)
    hi = min(n_batch, b0 + b0 // 2)
    best, best_dist = b0, None
    for b in range(lo, hi + 1):
        steps = -(-n_batch // b)
        if steps % 2 == 0:
            d = abs(b - b0)
            if best_dist is None or d < best_dist:
                best, best_dist = b, d
    return best


def conv2d_derivative(x, der_filter, resol, block_batch=None):
    """Pallas-TPU equivalent of Conv2dDerivative.forward.

    x          : (N, 1, H, W)
    der_filter : (1, 1, K, K) (or (K, K)) fixed derivative filter (concrete)
    resol      : python scalar
    block_batch: optional override of the batch block size (testing / tuning)
    returns    : (N, 1, H, W), dtype of x
    """
    N, C, H, W = x.shape
    assert C == 1, "Conv2dDerivative is defined for a single channel"

    wnp = np.asarray(der_filter, dtype=np.float64)
    wnp = wnp.reshape(wnp.shape[-2], wnp.shape[-1])
    K = wnp.shape[-1]
    assert wnp.shape == (K, K) and K % 2 == 1, "filter must be square, odd size"
    pad = (K - 1) // 2
    assert H > pad and W > pad, "reflect padding needs H, W > pad"

    # Bake the fixed weights and the 1/resol scale into compile-time constants;
    # drop zero taps; group by column offset so the lane roll is hoisted.
    # (Folding 1/resol per-tap differs from sum-then-divide only in rounding.)
    col_groups = {}
    for di in range(K):
        for dj in range(K):
            w = float(wnp[di, dj] / float(resol))
            if w != 0.0:
                col_groups.setdefault(dj - pad, []).append((di - pad, w))
    taps_by_col = tuple(
        (sw, tuple(sorted(col_groups[sw], key=lambda t: abs(t[0]))))
        for sw in sorted(col_groups, key=lambda s: (abs(s), s))
    )

    # --- block-size / VMEM policy --------------------------------------------
    # Small-VMEM parts (v7x: 64 MiB/TC): 4 MiB tiles, 48 MiB scoped limit.
    # 128 MiB parts (v5e/v6e): 8 MiB tiles, 96 MiB limit.  With the scratch
    # gone, double-buffered in + out plus in-kernel f32 temporaries fit easily.
    tile_target = 4 * 1024 * 1024
    vmem_limit = 48 * 1024 * 1024
    try:
        if pltpu.get_tpu_info().vmem_capacity_bytes >= 100 * 1024 * 1024:
            tile_target = 8 * 1024 * 1024
            vmem_limit = 96 * 1024 * 1024
    except Exception:
        pass  # keep the conservative (v7x-safe) defaults

    bytes_per_image = H * W * 4  # f32 compute
    if block_batch is not None:
        b_blk = max(1, min(int(block_batch), N))
    else:
        b_blk = _pick_batch_block(N, bytes_per_image, tile_target)
    grid = (pl.cdiv(N, b_blk),)

    kernel = functools.partial(_conv_deriv_kernel,
                               taps_by_col=taps_by_col, H=H, W=W)

    return pl.pallas_call(
        kernel,
        out_shape=jax.ShapeDtypeStruct((N, 1, H, W), x.dtype),
        grid=grid,
        in_specs=[pl.BlockSpec((b_blk, None, H, W), lambda b: (b, 0, 0, 0))],
        out_specs=pl.BlockSpec((b_blk, None, H, W), lambda b: (b, 0, 0, 0)),
        compiler_params=pltpu.CompilerParams(
            dimension_semantics=("parallel",),
            vmem_limit_bytes=vmem_limit,
        ),
    )(x)


def _reference(x, der_filter, resol):
    """Pure-JAX reference: reflect pad + explicit tap sum + /resol (f32)."""
    wnp = jnp.asarray(der_filter, jnp.float32)
    K = wnp.shape[-1]
    w = wnp.reshape(K, K)
    pad = (K - 1) // 2
    H, W = x.shape[-2:]
    xpad = jnp.pad(x.astype(jnp.float32),
                   ((0, 0), (0, 0), (pad, pad), (pad, pad)), mode="reflect")
    ref = jnp.zeros(x.shape, jnp.float32)
    for di in range(K):
        for dj in range(K):
            ref = ref + w[di, dj] * xpad[:, :, di:di + H, dj:dj + W]
    return (ref / resol).astype(x.dtype)


if __name__ == "__main__":
    # Classic 3x3 Laplacian derivative filter (module default kernel_size=3).
    der_filter = jnp.array(
        [[[[0.0, 1.0, 0.0],
           [1.0, -4.0, 1.0],
           [0.0, 1.0, 0.0]]]], dtype=jnp.float32)              # (1, 1, 3, 3)
    dx = 1.0 / 16.0
    resol = dx * dx

    key = jax.random.PRNGKey(0)
    k1, k2 = jax.random.split(key)

    # Main case (matches the module's single-channel forward).
    x = jax.random.normal(k1, (2, 1, 16, 16), dtype=jnp.float32)
    out = jax.block_until_ready(conv2d_derivative(x, der_filter, resol))
    ref = _reference(x, der_filter, resol)
    assert out.shape == x.shape and out.dtype == x.dtype
    assert jnp.allclose(out, ref, rtol=1e-4, atol=1e-2), (
        float(jnp.max(jnp.abs(out - ref))))

    # Partial-last-block path (grid = cdiv(N, b_blk)): N=5 with a forced
    # batch block of 2 -> 3 steps, last block masked on writeback.
    x2 = jax.random.normal(k2, (5, 1, 16, 16), dtype=jnp.float32)
    out2 = jax.block_until_ready(
        conv2d_derivative(x2, der_filter, resol, block_batch=2))
    ref2 = _reference(x2, der_filter, resol)
    assert jnp.allclose(out2, ref2, rtol=1e-4, atol=1e-2), (
        float(jnp.max(jnp.abs(out2 - ref2))))

    print("KERNEL_OK")
</pallas_src>

<mosaic_0001>
module attributes {stable_mosaic.version = 11 : i64} {
  func.func @_conv_deriv_kernel(%arg0: i32, %arg1: memref<2x1x16x16xf32, #tpu.memory_space<vmem>>, %arg2: memref<2x1x16x16xf32, #tpu.memory_space<vmem>>) attributes {dimension_semantics = [#tpu.dimension_semantics<parallel>], iteration_bounds = array<i64: 1>, scalar_prefetch = 0 : i64, scratch_operands = 0 : i64, tpu.core_type = #tpu.core_type<tc>, window_params = [{transform_indices = @transform_0, window_bounds = array<i64: 2, 1, 16, 16>}, {transform_indices = @transform_1, window_bounds = array<i64: 2, 1, 16, 16>}]} {
    %c0 = arith.constant 0 : index
    %c0_0 = arith.constant 0 : index
    %c0_1 = arith.constant 0 : index
    %c0_2 = arith.constant 0 : index
    %0 = vector.load %arg1[%c0, %c0_0, %c0_1, %c0_2] : memref<2x1x16x16xf32, #tpu.memory_space<vmem>>, vector<2x1x16x16xf32>
    %1 = vector.shape_cast %0 : vector<2x1x16x16xf32> to vector<2x16x16xf32>
    %2 = tpu.iota {dimensions = array<i32: 1>} : vector<16x16xi32>
    %3 = tpu.iota {dimensions = array<i32: 0>} : vector<16x16xi32>
    %cst = arith.constant -1.024000e+03 : f32
    %4 = vector.broadcast %cst : f32 to vector<2x16x16xf32>
    %5 = arith.mulf %4, %1 : vector<2x16x16xf32>
    %c1_i32 = arith.constant 1 : i32
    %6 = tpu.dynamic_rotate %1 by %c1_i32 dim 1 : vector<2x16x16xf32>, i32 -> vector<2x16x16xf32>
    %7 = vector.extract_strided_slice %1 {offsets = [0, 1, 0], sizes = [2, 1, 16], strides = [1, 1, 1]} : vector<2x16x16xf32> to vector<2x1x16xf32>
    %c0_i32 = arith.constant 0 : i32
    %8 = vector.broadcast %c0_i32 : i32 to vector<16x16xi32>
    %9 = arith.cmpi eq, %3, %8 : vector<16x16xi32>
    %10 = vector.shape_cast %9 : vector<16x16xi1> to vector<1x16x16xi1>
    %11 = vector.broadcast %10 : vector<1x16x16xi1> to vector<2x16x16xi1>
    %12 = vector.shape_cast %7 : vector<2x1x16xf32> to vector<2x1x16xf32>
    %13 = vector.broadcast %12 : vector<2x1x16xf32> to vector<2x16x16xf32>
    %14 = arith.select %11, %13, %6 : vector<2x16x16xi1>, vector<2x16x16xf32>
    %cst_3 = arith.constant 2.560000e+02 : f32
    %15 = vector.broadcast %cst_3 : f32 to vector<2x16x16xf32>
    %16 = arith.mulf %15, %14 : vector<2x16x16xf32>
    %17 = arith.addf %5, %16 : vector<2x16x16xf32>
    %c15_i32 = arith.constant 15 : i32
    %18 = tpu.dynamic_rotate %1 by %c15_i32 dim 1 : vector<2x16x16xf32>, i32 -> vector<2x16x16xf32>
    %19 = vector.extract_strided_slice %1 {offsets = [0, 14, 0], sizes = [2, 1, 16], strides = [1, 1, 1]} : vector<2x16x16xf32> to vector<2x1x16xf32>
    %c15_i32_4 = arith.constant 15 : i32
    %20 = vector.broadcast %c15_i32_4 : i32 to vector<16x16xi32>
    %21 = arith.cmpi eq, %3, %20 : vector<16x16xi32>
    %22 = vector.shape_cast %21 : vector<16x16xi1> to vector<1x16x16xi1>
    %23 = vector.broadcast %22 : vector<1x16x16xi1> to vector<2x16x16xi1>
    %24 = vector.shape_cast %19 : vector<2x1x16xf32> to vector<2x1x16xf32>
    %25 = vector.broadcast %24 : vector<2x1x16xf32> to vector<2x16x16xf32>
    %26 = arith.select %23, %25, %18 : vector<2x16x16xi1>, vector<2x16x16xf32>
    %cst_5 = arith.constant 2.560000e+02 : f32
    %27 = vector.broadcast %cst_5 : f32 to vector<2x16x16xf32>
    %28 = arith.mulf %27, %26 : vector<2x16x16xf32>
    %29 = arith.addf %17, %28 : vector<2x16x16xf32>
    %c1_i32_6 = arith.constant 1 : i32
    %30 = tpu.dynamic_rotate %1 by %c1_i32_6 dim 2 : vector<2x16x16xf32>, i32 -> vector<2x16x16xf32>
    %31 = vector.extract_strided_slice %1 {offsets = [0, 0, 1], sizes = [2, 16, 1], strides = [1, 1, 1]} : vector<2x16x16xf32> to vector<2x16x1xf32>
    %c0_i32_7 = arith.constant 0 : i32
    %32 = vector.broadcast %c0_i32_7 : i32 to vector<16x16xi32>
    %33 = arith.cmpi eq, %2, %32 : vector<16x16xi32>
    %34 = vector.shape_cast %33 : vector<16x16xi1> to vector<1x16x16xi1>
    %35 = vector.broadcast %34 : vector<1x16x16xi1> to vector<2x16x16xi1>
    %36 = vector.shape_cast %31 : vector<2x16x1xf32> to vector<2x16x1xf32>
    %37 = vector.broadcast %36 : vector<2x16x1xf32> to vector<2x16x16xf32>
    %38 = arith.select %35, %37, %30 : vector<2x16x16xi1>, vector<2x16x16xf32>
    %cst_8 = arith.constant 2.560000e+02 : f32
    %39 = vector.broadcast %cst_8 : f32 to vector<2x16x16xf32>
    %40 = arith.mulf %39, %38 : vector<2x16x16xf32>
    %41 = arith.addf %29, %40 : vector<2x16x16xf32>
    %c15_i32_9 = arith.constant 15 : i32
    %42 = tpu.dynamic_rotate %1 by %c15_i32_9 dim 2 : vector<2x16x16xf32>, i32 -> vector<2x16x16xf32>
    %43 = vector.extract_strided_slice %1 {offsets = [0, 0, 14], sizes = [2, 16, 1], strides = [1, 1, 1]} : vector<2x16x16xf32> to vector<2x16x1xf32>
    %c15_i32_10 = arith.constant 15 : i32
    %44 = vector.broadcast %c15_i32_10 : i32 to vector<16x16xi32>
    %45 = arith.cmpi eq, %2, %44 : vector<16x16xi32>
    %46 = vector.shape_cast %45 : vector<16x16xi1> to vector<1x16x16xi1>
    %47 = vector.broadcast %46 : vector<1x16x16xi1> to vector<2x16x16xi1>
    %48 = vector.shape_cast %43 : vector<2x16x1xf32> to vector<2x16x1xf32>
    %49 = vector.broadcast %48 : vector<2x16x1xf32> to vector<2x16x16xf32>
    %50 = arith.select %47, %49, %42 : vector<2x16x16xi1>, vector<2x16x16xf32>
    %cst_11 = arith.constant 2.560000e+02 : f32
    %51 = vector.broadcast %cst_11 : f32 to vector<2x16x16xf32>
    %52 = arith.mulf %51, %50 : vector<2x16x16xf32>
    %53 = arith.addf %41, %52 : vector<2x16x16xf32>
    %c0_12 = arith.constant 0 : index
    %c0_13 = arith.constant 0 : index
    %c0_14 = arith.constant 0 : index
    %c0_15 = arith.constant 0 : index
    %54 = vector.load %arg2[%c0_12, %c0_13, %c0_14, %c0_15] : memref<2x1x16x16xf32, #tpu.memory_space<vmem>>, vector<2x1x16x16xf32>
    %55 = vector.shape_cast %54 : vector<2x1x16x16xf32> to vector<2x16x16xf32>
    %56 = vector.shape_cast %53 : vector<2x16x16xf32> to vector<2x1x16x16xf32>
    tpu.vector_store %arg2[%c0_12, %c0_13, %c0_14, %c0_15], %56 {strides = array<i32>} : memref<2x1x16x16xf32, #tpu.memory_space<vmem>>, vector<2x1x16x16xf32>,
    return
  }
  func.func @transform_0(%arg0: i32) -> (i32, i32, i32, i32) {
    %c0_i32 = arith.constant 0 : i32
    %c0_i32_0 = arith.constant 0 : i32
    %c0_i32_1 = arith.constant 0 : i32
    %c0_i32_2 = arith.constant 0 : i32
    return %arg0, %c0_i32, %c0_i32_0, %c0_i32_1 : i32, i32, i32, i32
  }
  func.func @transform_1(%arg0: i32) -> (i32, i32, i32, i32) {
    %c0_i32 = arith.constant 0 : i32
    %c0_i32_0 = arith.constant 0 : i32
    %c0_i32_1 = arith.constant 0 : i32
    %c0_i32_2 = arith.constant 0 : i32
    return %arg0, %c0_i32, %c0_i32_0, %c0_i32_1 : i32, i32, i32, i32
  }
}

</mosaic_0001>

<bundles_post_ra>
// kernel: tpu_custom_call.1
= control target key start
LH: loop header
LB: loop body
LE: loop exit
PB: predicated region body
PF: predicated region fallthrough
CT: control target
= control target key end

     0   :  { %6 = vsyncpa [#allocation3], 0  ;;  %s463_s0 = inlined_call_operand.hbm [shape: f32[2,1,16,16], index: 0, kind: input, shape index: {}]   ;;  %s464_s1 = inlined_call_operand.hbm [shape: f32[2,1,16,16], index: 1, kind: output, shape index: {}]  }
   0x1   :  { %7 = vsyncpa [#allocation4], 0  ;;  %s308_s6 = smov [#allocation2]   ;;  %s260_s10 = scalar_lea.hbm %s463_s0, 512 }
   0x2   :  { %s13_s7 = sshll.u32 %s308_s6, 4  ;;  %p261_p0 = scmp.ne.s32.totalorder %s463_s0, %s260_s10  ;;  %s14_s7 = int_to_ptr.vmem [resolvable:$true] %s13_s7 }
   0x3   :  { %p264_p1 = scmp.lt.u32.totalorder %s260_s10, %s463_s0 }
   0x5   :  { %p266_p2 = pnand %p264_p1, %p261_p0 }
   0x7   :  { %269 = shalt.err (!%p266_p2)
}
   0x8   :  { %s270_s15 = scalar_lea.vmem %s14_s7, 512  ;;  %p275_p4 = scmp.lt.s32.totalorder %s14_s7, %s14_s7 }
   0x9   :  { %p271_p3 = scmp.ne.s32.totalorder %s14_s7, %s270_s15  ;;  %p276_p5 = scmp.lt.s32.totalorder %s270_s15, %s270_s15 }
   0xb   :  { %p277_p6 = por %p276_p5, %p275_p4 }
   0xd   :  { %p278_p7 = pnand %p277_p6, %p271_p3 }
   0xf   :  { %281 = shalt.err (!%p278_p7)
}
  0x10   :  { %s309_s16 = smov 128   ;;  %s310_s17 = smov 8  }
  0x11   :  { %19 = dma.hbm_to_vmem [thread:$0]  %s463_s0, 512, %s14_s7, [#allocation3], %s309_s16, %s309_s16, %s310_s17  }
  0x12   :  { %304 = dma.done.wait [#allocation3], 512  }
  0x13   :  { %305 = vsyncadd [#allocation3], 4294966784  ;;  %v311_v0 = vmov 1   ;;  %v342_v1 = vld [vmem:[#allocation2] sm:$0xff]  ;;  %v344_v2 = vld [vmem:[#allocation2 + $0x10] sm:$0xff]  ;;  %s312_s20 = smov 16   ;;  %v27_v23 = vlaneseq }
  0x14   :  { %257 = vset.pattern.permute.xlu1 %v311_v0  ;;  %256 = vset.pattern.permute.xlu0 %v311_v0  ;;  %v348_v3 = vld [vmem:[#allocation2 + $0x8] sm:$0xff]  ;;  %v350_v4 = vld [vmem:[#allocation2 + $0x18] sm:$0xff]  ;;  %vm106_vm0 = vcmask 1047680   ;;  %v313_v13 = vmov 14   ;;  %s314_s0 = smov 113   ;;  %s315_s21 = smov 127  }
  0x15   :  { %107 = vrot.lane.b32.xlu0 %v342_v1, %s312_s20  ;;  %113 = vrot.lane.b32.xlu1 %v344_v2, %s312_s20  ;;  %v30_v24 = vshrl.u32 %v27_v23, 7  ;;  %v38_v28 = vrot.slane %v348_v3, 7  ;;  %v36_v29 = vrot.slane %v342_v1, 7  ;;  %v37_v34 = vrot.slane %v344_v2, 7  ;;  %s316_s22 = smov [#allocation5]  }
  0x16   :  { %v39_v35 = vrot.slane %v350_v4, 7  ;;  %v73_v36 = vrot.slane %v348_v3, 1  ;;  %v71_v38 = vrot.slane %v342_v1, 1  ;;  %v401_v45 = vand.u32 127, %v27_v23  ;;  %s235_s23 = sshll.u32 %s316_s22, 4  ;;  %s236_s23 = int_to_ptr.vmem [resolvable:$true] %s235_s23 }
  0x17   :  { %v53_v27 = vsub.s32 1, %v30_v24  ;;  %vm40_vm1 = vcmp.lt.s32.totalorder %v30_v24, 1  ;;  %vm45_vm2 = vcmp.eq.s32.totalorder %v30_v24, 0  ;;  %v88_v39 = vsub.s32 6, %v30_v24  ;;  %s282_s24 = scalar_lea.vmem %s236_s23, 512  ;;  %p287_p9 = scmp.lt.s32.totalorder %s236_s23, %s236_s23 }
  0x18   :  { %v43_v33 = vsel %vm40_vm1, %v38_v28, %v36_v29  ;;  %vm75_vm3 = vcmp.lt.s32.totalorder %v30_v24, 7  ;;  %v31_v43 = vadd.s32 8, %v30_v24  ;;  %v44_v44 = vsel %vm40_vm1, %v39_v35, %v37_v34  ;;  %p283_p8 = scmp.ne.s32.totalorder %s236_s23, %s282_s24  ;;  %p288_p10 = scmp.lt.s32.totalorder %s282_s24, %s282_s24 }
  0x19   :  { %110 = vrot.lane.b32.xlu0 %v348_v3, %s312_s20  ;;  %116 = vrot.lane.b32.xlu1 %v350_v4, %s312_s20  ;;  %v54_v32 = vrot.slane %v342_v1, %v53_v27  ;;  %v58_v40 = vrot.slane %v344_v2, %v53_v27  ;;  %v32_v46 = vmul.f32 -1024.0, %v342_v1  ;;  %v76_v48 = vsel %vm75_vm3, %v71_v38, %v73_v36 }
  0x1a   :  { %v89_v49 = vrot.slane %v348_v3, %v88_v39  ;;  %v41_v50 = vsel %vm40_vm1, %v36_v29, %v38_v28  ;;  %vm81_vm4 = vcmp.eq.s32.totalorder %v31_v43, 15  ;;  %v78_v52 = vsel %vm75_vm3, %v73_v36, %v71_v38  ;;  %p289_p11 = por %p288_p10, %p287_p9 }
  0x1b   :  { %v59_v37 = vsel %vm45_vm2, %v54_v32, %v43_v33  ;;  %v61_v51 = vsel %vm45_vm2, %v58_v40, %v44_v44  ;;  %v72_v53 = vrot.slane %v344_v2, 1  ;;  %v74_v54 = vrot.slane %v350_v4, 1 }
  0x1c   :  { %v63_v47 = vmul.f32 256.0, %v59_v37  ;;  %vm131_vm5 = vcmp.eq.s32.totalorder %v401_v45, 0  ;;  %v98_v58 = vmul.f32 256.0, %v76_v48  ;;  %v33_v59 = vmul.f32 -1024.0, %v348_v3  ;;  %p290_p12 = pnand %p289_p11, %p283_p8 }
  0x1d   :  { %v64_v60 = vmul.f32 256.0, %v41_v50  ;;  %v95_v61 = vsel %vm81_vm4, %v89_v49, %v78_v52  ;;  %v34_v62 = vmul.f32 -1024.0, %v344_v2  ;;  %v65_v63 = vmul.f32 256.0, %v61_v51 }
  0x1e   :  { %v67_v57 = vadd.f32 %v63_v47, %v32_v46  ;;  %v77_v0 = vsel %vm75_vm3, %v72_v53, %v74_v54  ;;  %vm182_vm6 = vcmp.eq.s32.totalorder %v401_v45, 15  ;;  %vm225_vm7 = vcmask 130048  }
  0x87   :  { %v108_v5 = vpop.permute.xlu0 %107  ;;  %v114_v6 = vpop.permute.xlu1 %113 }
  0x88   :  { %v109_v7 = vsel %vm106_vm0, %v108_v5, %v342_v1  ;;  %v115_v8 = vsel %vm106_vm0, %v114_v6, %v344_v2  ;;  %v93_v5 = vrot.slane %v350_v4, %v88_v39 }
  0x89   :  { %119 = vrot.lane.b32.xlu0 %v109_v7, %s312_s20  ;;  %v79_v7 = vsel %vm75_vm3, %v74_v54, %v72_v53 }
  0x8b   :  { %v111_v9 = vpop.permute.xlu0 %110  ;;  %v117_v10 = vpop.permute.xlu1 %116 }
  0x8c   :  { %v112_v11 = vsel %vm106_vm0, %v111_v9, %v348_v3  ;;  %v118_v12 = vsel %vm106_vm0, %v117_v10, %v350_v4  ;;  %v99_v10 = vmul.f32 256.0, %v95_v61 }
  0x8d   :  { %123 = vrot.lane.b32.xlu0 %v115_v8, %s312_s20  ;;  %121 = vrot.lane.b32.xlu1 %v112_v11, %s312_s20  ;;  %v102_v8 = vadd.f32 %v98_v58, %v67_v57 }
  0x91   :  { %125 = vrot.lane.b32.xlu1 %v118_v12, %s312_s20  ;;  %136 = vperm.xlu0 %256, %v342_v1   ;;  %v69_v12 = vadd.f32 %v65_v63, %v34_v62 }
  0x95   :  { %141 = vperm.xlu1 %257, %v348_v3   ;;  %151 = vperm.xlu0 %256, %v350_v4  }
  0x99   :  { %146 = vperm.xlu1 %257, %v344_v2   ;;  %259 = vset.pattern.permute.xlu0 %v313_v13 }
  0x9a   :  { %190 = vperm.xlu0 %259, %v348_v3  }
  0x9d   :  { %258 = vset.pattern.permute.xlu1 %v313_v13  ;;  %v100_v13 = vmul.f32 256.0, %v77_v0 }
  0x9e   :  { %186 = vperm.xlu1 %258, %v342_v1  }
  0xa2   :  { %194 = vperm.xlu1 %258, %v344_v2  }
  0xa6   :  { %198 = vperm.xlu1 %258, %v350_v4  }
  0xfb   :  { %v120_v14 = vpop.permute.xlu0 %119 }
  0xfc   :  { %v127_v15 = vsel %vm106_vm0, %v120_v14, %v342_v1  ;;  %v42_v1 = vsel %vm40_vm1, %v37_v34, %v39_v35 }
  0xfd   :  { %158 = vrot.lane.b32.xlu0 %v127_v15, %s314_s0  ;;  %v66_v14 = vmul.f32 256.0, %v42_v1 }
  0xff   :  { %v122_v16 = vpop.permute.xlu1 %121  ;;  %v124_v17 = vpop.permute.xlu0 %123 }
 0x100   :  { %v128_v18 = vsel %vm106_vm0, %v122_v16, %v348_v3  ;;  %v129_v19 = vsel %vm106_vm0, %v124_v17, %v344_v2  ;;  %v68_v3 = vadd.f32 %v64_v60, %v33_v59  ;;  %v35_v2 = vmul.f32 -1024.0, %v350_v4 }
 0x101   :  { %160 = vrot.lane.b32.xlu1 %v128_v18, %s314_s0  ;;  %162 = vrot.lane.b32.xlu0 %v129_v19, %s314_s0  ;;  %v97_v17 = vsel %vm81_vm4, %v93_v5, %v79_v7 }
 0x102   :  { %v70_v24 = vadd.f32 %v66_v14, %v35_v2 }
 0x103   :  { %v126_v20 = vpop.permute.xlu1 %125 }
 0x104   :  { %v130_v21 = vsel %vm106_vm0, %v126_v20, %v350_v4  ;;  %v101_v4 = vmul.f32 256.0, %v97_v17 }
 0x105   :  { %164 = vrot.lane.b32.xlu1 %v130_v21, %s314_s0  ;;  %201 = vrot.lane.b32.xlu0 %v127_v15, %s315_s21 }
 0x106   :  { %v105_v36 = vadd.f32 %v101_v4, %v70_v24 }
 0x109   :  { %203 = vrot.lane.b32.xlu1 %v128_v18, %s315_s21  ;;  %205 = vrot.lane.b32.xlu0 %v129_v19, %s315_s21  ;;  %v103_v19 = vadd.f32 %v99_v10, %v68_v3 }
 0x10d   :  { %207 = vrot.lane.b32.xlu1 %v130_v21, %s315_s21 }
 0x110   :  { %v137_v26 = vpop.permute.xlu0 %136 }
 0x114   :  { %v378_v22 = vpop.permute.xlu1 %141  ;;  %v386_v31 = vpop.permute.xlu0 %151 }
 0x118   :  { %v380_v25 = vpop.permute.xlu1 %146 }
 0x119   :  { %v398_v42 = vpop.permute.xlu0 %190 }
 0x11d   :  { %v384_v30 = vpop.permute.xlu1 %186 }
 0x121   :  { %v396_v41 = vpop.permute.xlu1 %194 }
 0x125   :  { %v199_v55 = vpop.permute.xlu1 %198 }
 0x16f   :  { %v159_v56 = vpop.permute.xlu0 %158 }
 0x170   :  { %v170_v6 = vsel %vm131_vm5, %v137_v26, %v159_v56 }
 0x171   :  { %v174_v15 = vmul.f32 256.0, %v170_v6 }
 0x173   :  { %v161_v9 = vpop.permute.xlu1 %160  ;;  %v163_v11 = vpop.permute.xlu0 %162  ;;  %v178_v27 = vadd.f32 %v174_v15, %v102_v8 }
 0x174   :  { %v171_v16 = vsel %vm131_vm5, %v378_v22, %v161_v9  ;;  %v172_v18 = vsel %vm131_vm5, %v380_v25, %v163_v11  ;;  %v104_v22 = vadd.f32 %v100_v13, %v69_v12 }
 0x175   :  { %v175_v23 = vmul.f32 256.0, %v171_v16  ;;  %v176_v28 = vmul.f32 256.0, %v172_v18 }
 0x177   :  { %v165_v20 = vpop.permute.xlu1 %164  ;;  %v202_v21 = vpop.permute.xlu0 %201  ;;  %v179_v35 = vadd.f32 %v175_v23, %v103_v19  ;;  %v180_v38 = vadd.f32 %v176_v28, %v104_v22 }
 0x178   :  { %v213_v26 = vsel %vm182_vm6, %v384_v30, %v202_v21  ;;  %v173_v32 = vsel %vm131_vm5, %v386_v31, %v165_v20 }
 0x179   :  { %v217_v29 = vmul.f32 256.0, %v213_v26  ;;  %v177_v39 = vmul.f32 256.0, %v173_v32 }
 0x17b   :  { %v221_v25 = vadd.f32 %v217_v29, %v178_v27  ;;  %v204_v33 = vpop.permute.xlu1 %203  ;;  %v206_v34 = vpop.permute.xlu0 %205  ;;  %v181_v48 = vadd.f32 %v177_v39, %v105_v36 }
 0x17c   :  { %v214_v37 = vsel %vm182_vm6, %v398_v42, %v204_v33  ;;  %v215_v30 = vsel %vm182_vm6, %v396_v41, %v206_v34 }
 0x17d   :  { %v218_v40 = vmul.f32 256.0, %v214_v37  ;;  %v219_v43 = vmul.f32 256.0, %v215_v30  ;;  %226 = vst.msk [vmem:[#allocation5] sm:$0xff] %vm225_vm7, %v221_v25 }
 0x17f   :  { %v222_v31 = vadd.f32 %v218_v40, %v179_v35  ;;  %v223_v44 = vadd.f32 %v219_v43, %v180_v38  ;;  %v208_v46 = vpop.permute.xlu1 %207 }
 0x180   :  { %v216_v47 = vsel %vm182_vm6, %v199_v55, %v208_v46 }
 0x181   :  { %v220_v42 = vmul.f32 256.0, %v216_v47  ;;  %227 = vst.msk [vmem:[#allocation5 + $0x8] sm:$0xff] %vm225_vm7, %v222_v31  ;;  %228 = vst.msk [vmem:[#allocation5 + $0x10] sm:$0xff] %vm225_vm7, %v223_v44 }
 0x183   :  { %v224_v41 = vadd.f32 %v220_v42, %v181_v48 }
 0x185   :  { %229 = vst.msk [vmem:[#allocation5 + $0x18] sm:$0xff] %vm225_vm7, %v224_v41 }
 0x186   :  { %293 = shalt.err (!%p290_p12)
}
 0x187   :  { %s294_s27 = scalar_lea.hbm %s464_s1, 512 }
 0x188   :  { %p295_p13 = scmp.ne.s32.totalorder %s464_s1, %s294_s27  ;;  %p298_p0 = scmp.lt.u32.totalorder %s294_s27, %s464_s1 }
 0x18a   :  { %p300_p1 = pnand %p298_p0, %p295_p13 }
 0x18c   :  { %303 = shalt.err (!%p300_p1)
}
 0x18d   :  { %241 = dma.vmem_to_hbm [thread:$0]  %s236_s23, 512, %s464_s1, [#allocation4], %s309_s16, %s309_s16, %s310_s17  }
 0x18e   :  { %306 = dma.done.wait [#allocation4], 512  }
 0x18f   :  { %307 = vsyncadd [#allocation4], 4294966784 }
 0x190   :  { %245 = vsyncpa [#allocation3], 1 }
 0x191   :  { %246 = vsyncpa [#allocation4], 1 }

</bundles_post_ra>
